<compile_context>
chip_gen: v7x
topology: tpu7x:2x2x1
jax: 0.10.0
libtpu: 0.0.40
codegen_flags: <defaults>
</compile_context>

<pallas_src>
import jax
import jax.numpy as jnp
from jax.experimental import pallas as pl
from jax.experimental.pallas import tpu as pltpu

_LANE_CANDIDATES = (1024, 512, 256, 128)
_MAX_BUFFER_BYTES = 2 * 1024 * 1024  # 2 MiB per block buffer (v5e-safe)


def log_kernel(x_ref, o_ref):
    # f = log(0.1 + relu(x)); math in f32 (relu/add on VPU, log on EUP),
    # storage stays in the I/O dtype.
    xf = x_ref[...].astype(jnp.float32)
    o_ref[...] = jnp.log(0.1 + jnp.maximum(xf, 0.0)).astype(o_ref.dtype)


def _pick_tile_rows(rows, lanes, itemsize, pack):
    """Pick (tile_rows, padded_rows) with tile buffers <= _MAX_BUFFER_BYTES."""
    cap_rows = max(pack, _MAX_BUFFER_BYTES // (lanes * itemsize))
    if rows <= cap_rows:
        # Whole array is a single block (block == full dims, no (8,128) issue).
        return rows, rows
    # Largest multiple-of-pack divisor of `rows` that fits the buffer cap
    # -> grid >= 2, no row padding.
    start = cap_rows - (cap_rows % pack)
    for tb in range(start, 0, -pack):
        if rows % tb == 0:
            return tb, rows
    # No clean divisor: pad rows up to a multiple of the capped tile height.
    tb = start
    padded = ((rows + tb - 1) // tb) * tb
    return tb, padded


def log_forward(x):
    """Elementwise log(0.1 + relu(x)) for an arbitrarily-shaped tensor."""
    orig_shape = x.shape

    # PyTorch promotes integer inputs to float; match that (edge case only).
    if not jnp.issubdtype(x.dtype, jnp.floating):
        x = x.astype(jnp.float32)
    dtype = x.dtype
    total = x.size
    if total == 0:
        return jnp.zeros(orig_shape, dtype)

    itemsize = jnp.dtype(dtype).itemsize
    pack = max(8, 32 // itemsize)  # sublane packing: f32->8, bf16->16, int8->32

    # Lane-dense last dim: pick the widest candidate that divides the element
    # count so no padding is needed; fall back to 512 + padding otherwise.
    lanes = None
    for cand in _LANE_CANDIDATES:
        if total % cand == 0:
            lanes = cand
            break
    if lanes is None:
        lanes = 512

    rows_needed = -(-total // lanes)  # cdiv
    tb, rows_padded = _pick_tile_rows(rows_needed, lanes, itemsize, pack)
    padded_total = rows_padded * lanes

    xf = x.reshape(-1)  # layout-free flatten
    if padded_total != total:
        # Rare path: zero padding is harmless (log(0.1) is finite).
        xf = jnp.pad(xf, (0, padded_total - total))
    x2 = xf.reshape(rows_padded, lanes)

    grid = (rows_padded // tb,)

    out = pl.pallas_call(
        log_kernel,
        out_shape=jax.ShapeDtypeStruct((rows_padded, lanes), dtype),
        grid=grid,
        in_specs=[pl.BlockSpec((tb, lanes), lambda i: (i, 0))],
        out_specs=pl.BlockSpec((tb, lanes), lambda i: (i, 0)),
        compiler_params=pltpu.CompilerParams(
            dimension_semantics=("parallel",)),
        cost_estimate=pl.CostEstimate(
            flops=2 * padded_total,
            transcendentals=padded_total,
            bytes_accessed=2 * padded_total * itemsize),
    )(x2)

    if padded_total != total:
        out = out.reshape(-1)[:total]
    return out.reshape(orig_shape)


def log_reference(x):
    if not jnp.issubdtype(x.dtype, jnp.floating):
        x = x.astype(jnp.float32)
    return jnp.log(0.1 + jnp.maximum(x, 0.0))


if __name__ == "__main__":
    key = jax.random.PRNGKey(0)

    # f32 case: 2048 elements -> single (2, 1024) block, no padding, no casts.
    x = jax.random.normal(key, (2, 4, 16, 16), dtype=jnp.float32)
    out = jax.block_until_ready(log_forward(x))
    ref = log_reference(x)
    assert out.shape == x.shape and out.dtype == x.dtype
    assert jnp.allclose(out, ref, atol=1e-5, rtol=1e-5), "f32 mismatch vs reference"

    # bf16 case (narrow I/O, padded fallback path): 105 elements.
    xb = jax.random.normal(jax.random.PRNGKey(1), (3, 5, 7), dtype=jnp.bfloat16)
    outb = jax.block_until_ready(log_forward(xb))
    refb = log_reference(xb)
    assert outb.shape == xb.shape and outb.dtype == xb.dtype
    assert jnp.allclose(outb.astype(jnp.float32), refb.astype(jnp.float32),
                        atol=2e-2, rtol=2e-2), "bf16 mismatch vs reference"

    print("KERNEL_OK")
</pallas_src>

<mosaic_0001>
module attributes {stable_mosaic.version = 11 : i64} {
  func.func @log_kernel(%arg0: i32, %arg1: memref<2x1024xf32, #tpu.memory_space<vmem>>, %arg2: memref<2x1024xf32, #tpu.memory_space<vmem>>) attributes {dimension_semantics = [#tpu.dimension_semantics<parallel>], iteration_bounds = array<i64: 1>, scalar_prefetch = 0 : i64, scratch_operands = 0 : i64, tpu.core_type = #tpu.core_type<tc>, window_params = [{transform_indices = @transform_0, window_bounds = array<i64: 2, 1024>}, {transform_indices = @transform_1, window_bounds = array<i64: 2, 1024>}]} {
    %c0 = arith.constant 0 : index
    %c0_0 = arith.constant 0 : index
    %0 = vector.load %arg1[%c0, %c0_0] : memref<2x1024xf32, #tpu.memory_space<vmem>>, vector<2x1024xf32>
    %cst = arith.constant 0.000000e+00 : f32
    %1 = vector.broadcast %cst : f32 to vector<2x1024xf32>
    %2 = arith.maximumf %0, %1 : vector<2x1024xf32>
    %cst_1 = arith.constant 1.000000e-01 : f32
    %3 = vector.broadcast %cst_1 : f32 to vector<2x1024xf32>
    %4 = arith.addf %3, %2 : vector<2x1024xf32>
    %5 = math.log %4 : vector<2x1024xf32>
    %c0_2 = arith.constant 0 : index
    %c0_3 = arith.constant 0 : index
    %6 = vector.load %arg2[%c0_2, %c0_3] : memref<2x1024xf32, #tpu.memory_space<vmem>>, vector<2x1024xf32>
    tpu.vector_store %arg2[%c0_2, %c0_3], %5 {strides = array<i32>} : memref<2x1024xf32, #tpu.memory_space<vmem>>, vector<2x1024xf32>,
    return
  }
  func.func @transform_0(%arg0: i32) -> (i32, i32) {
    %c0_i32 = arith.constant 0 : i32
    %c0_i32_0 = arith.constant 0 : i32
    return %arg0, %c0_i32 : i32, i32
  }
  func.func @transform_1(%arg0: i32) -> (i32, i32) {
    %c0_i32 = arith.constant 0 : i32
    %c0_i32_0 = arith.constant 0 : i32
    return %arg0, %c0_i32 : i32, i32
  }
}

</mosaic_0001>

<bundles_post_ra>
// kernel: tpu_custom_call.1
= control target key start
LH: loop header
LB: loop body
LE: loop exit
PB: predicated region body
PF: predicated region fallthrough
CT: control target
= control target key end

     0   :  { %6 = vsyncpa [#allocation3], 0  ;;  %s138_s0 = inlined_call_operand.hbm [shape: f32[2,1024], index: 0, kind: input, shape index: {}]   ;;  %s139_s1 = inlined_call_operand.hbm [shape: f32[2,1024], index: 1, kind: output, shape index: {}]  }
   0x1   :  { %7 = vsyncpa [#allocation4], 0  ;;  %s102_s6 = smov [#allocation2]   ;;  %s54_s10 = scalar_lea.hbm %s138_s0, 256 }
   0x2   :  { %s14_s7 = sshll.u32 %s102_s6, 4  ;;  %p55_p0 = scmp.ne.s32.totalorder %s138_s0, %s54_s10  ;;  %s15_s7 = int_to_ptr.vmem [resolvable:$true] %s14_s7 }
   0x3   :  { %p58_p1 = scmp.lt.u32.totalorder %s54_s10, %s138_s0 }
   0x5   :  { %p60_p2 = pnand %p58_p1, %p55_p0 }
   0x7   :  { %63 = shalt.err (!%p60_p2)
}
   0x8   :  { %s64_s15 = scalar_lea.vmem %s15_s7, 256  ;;  %p69_p4 = scmp.lt.s32.totalorder %s15_s7, %s15_s7 }
   0x9   :  { %p65_p3 = scmp.ne.s32.totalorder %s15_s7, %s64_s15  ;;  %p70_p5 = scmp.lt.s32.totalorder %s64_s15, %s64_s15 }
   0xb   :  { %p71_p6 = por %p70_p5, %p69_p4 }
   0xd   :  { %p72_p7 = pnand %p71_p6, %p65_p3 }
   0xf   :  { %75 = shalt.err (!%p72_p7)
}
  0x10   :  { %17 = dma.hbm_to_vmem [thread:$0]  %s138_s0, 256, %s15_s7, [#allocation3]  }
  0x11   :  { %98 = dma.done.wait [#allocation3], 256  }
  0x12   :  { %99 = vsyncadd [#allocation3], 4294967040  ;;  %v21_v0 = vld [vmem:[#allocation2] sm:$0xff]  ;;  %v22_v1 = vld [vmem:[#allocation2 + $0x8] sm:$0xff]  ;;  %s103_s18 = smov [#allocation5]  }
  0x13   :  { %v23_v2 = vmax.f32 %v21_v0, 0.0  ;;  %v24_v3 = vmax.f32 %v22_v1, 0.0  ;;  %s39_s19 = sshll.u32 %s103_s18, 4  ;;  %s40_s19 = int_to_ptr.vmem [resolvable:$true] %s39_s19 }
  0x14   :  { %s76_s0 = scalar_lea.vmem %s40_s19, 256  ;;  %p81_p9 = scmp.lt.s32.totalorder %s40_s19, %s40_s19 }
  0x15   :  { %v25_v4 = vadd.f32 0.1, %v23_v2  ;;  %v26_v5 = vadd.f32 0.1, %v24_v3  ;;  %p77_p8 = scmp.ne.s32.totalorder %s40_s19, %s76_s0  ;;  %p82_p10 = scmp.lt.s32.totalorder %s76_s0, %s76_s0 }
  0x17   :  { %50 = vlog2.f32 %v25_v4  ;;  %p83_p11 = por %p82_p10, %p81_p9 }
  0x18   :  { %52 = vlog2.f32 %v26_v5 }
  0x19   :  { %p84_p12 = pnand %p83_p11, %p77_p8 }
  0x21   :  { %v51_v6 = vpop.eup %50 }
  0x22   :  { %v53_v7 = vpop.eup %52  ;;  %v28_v8 = vmul.f32 0.6931472, %v51_v6 }
  0x23   :  { %v30_v9 = vmul.f32 0.6931472, %v53_v7 }
  0x24   :  { %31 = vst [vmem:[#allocation5] sm:$0xff] %v28_v8 }
  0x25   :  { %32 = vst [vmem:[#allocation5 + $0x8] sm:$0xff] %v30_v9 }
  0x26   :  { %87 = shalt.err (!%p84_p12)
}
  0x27   :  { %s88_s22 = scalar_lea.hbm %s139_s1, 256 }
  0x28   :  { %p89_p13 = scmp.ne.s32.totalorder %s139_s1, %s88_s22  ;;  %p92_p0 = scmp.lt.u32.totalorder %s88_s22, %s139_s1 }
  0x2a   :  { %p94_p1 = pnand %p92_p0, %p89_p13 }
  0x2c   :  { %97 = shalt.err (!%p94_p1)
}
  0x2d   :  { %42 = dma.vmem_to_hbm [thread:$0]  %s40_s19, 256, %s139_s1, [#allocation4]  }
  0x2e   :  { %100 = dma.done.wait [#allocation4], 256  }
  0x2f   :  { %101 = vsyncadd [#allocation4], 4294967040 }
  0x30   :  { %46 = vsyncpa [#allocation3], 1 }
  0x31   :  { %47 = vsyncpa [#allocation4], 1 }

</bundles_post_ra>
